<compile_context>
chip_gen: v6e
topology: v6e:2x2x1
jax: 0.10.0
libtpu: 0.0.40
codegen_flags: <defaults>
</compile_context>

<pallas_src>
import jax
import jax.numpy as jnp
from jax.experimental import pallas as pl
from jax.experimental.pallas import tpu as pltpu

_LANE = 128     # lane width: hidden dims padded to a multiple of this
_SUBLANE = 8    # sublane width: batch tile rounded to a multiple of this


def _round_up(x, m):
    return (x + m - 1) // m * m


def hypernet_kernel(x_ref, w1_ref, b1_ref, w2_ref, b2_ref, w3_ref, b3_ref, o_ref):
    """One batch-tile of the 3-layer MLP.

    x_ref : (TB, in_f)                 (in_f unpadded; full-dim block)
    w1    : (in_f,  HID_P)   b1: (1, HID_P)
    w2    : (HID_P, HID_P)   b2: (1, HID_P)
    w3    : (HID_P, out_f)   b3: (1, out_f)   (out_f unpadded; full-dim block)
    o_ref : (TB, out_f)
    """
    # Cast of x / h1 / h2 to the weight dtype is a no-op in f32 mode and
    # enables bf16 MXU passes when bf16 weights are used.
    x = x_ref[...].astype(w1_ref.dtype)

    h1 = jnp.dot(x, w1_ref[...], preferred_element_type=jnp.float32) + b1_ref[...]
    h1 = jnp.maximum(h1, 0.0)

    h2 = jnp.dot(h1.astype(w2_ref.dtype), w2_ref[...],
                 preferred_element_type=jnp.float32) + b2_ref[...]
    h2 = jnp.maximum(h2, 0.0)

    out = jnp.dot(h2.astype(w3_ref.dtype), w3_ref[...],
                  preferred_element_type=jnp.float32) + b3_ref[...]
    o_ref[...] = out.astype(o_ref.dtype)


def hypernetwork_forward(x, params, *, tile_b=None):
    """x: (B, in_features) float32. params: dict from init_params."""
    B, in_f = x.shape
    w1, b1 = params["w1"], params["b1"]
    w2, b2 = params["w2"], params["b2"]
    w3, b3 = params["w3"], params["b3"]
    in_w, hid_pad = w1.shape
    out_f = w3.shape[1]
    assert in_f == in_w, f"input feature dim {in_f} != weight rows {in_w}"

    # ---- tile selection (generation-aware heuristic):
    #   * B <= 1024: one grid step — no per-step overhead; v5e/v6e have a
    #     single TensorCore so multiple steps buy nothing at this size.
    #   * B  > 1024: >= 4 steps (>= 2 per v7x TensorCore) of up-to-2048 rows,
    #     256-aligned, so DMA/compute overlap works on both cores and the
    #     ~0.35us/step overhead stays amortized.
    if tile_b is None:
        if B <= 1024:
            tile_b = _round_up(max(B, _SUBLANE), _SUBLANE)
        else:
            tile_b = min(2048, max(256, _round_up(pl.cdiv(B, 4), 256)))
    tile_b = max(_SUBLANE, _round_up(tile_b, _SUBLANE))

    # ---- pad batch only (no feature padding of x)
    B_pad = _round_up(B, tile_b)
    if B_pad != B:
        x = jnp.pad(x, ((0, B_pad - B), (0, 0)))

    grid = (B_pad // tile_b,)

    itemsize = jnp.dtype(w1.dtype).itemsize
    flops = 2 * B_pad * (in_f * hid_pad + hid_pad * hid_pad + hid_pad * out_f)
    bytes_accessed = (
        4 * (B_pad * in_f + B_pad * out_f)
        + itemsize * (in_f * hid_pad + hid_pad
                      + hid_pad * hid_pad + hid_pad
                      + hid_pad * out_f + out_f)
    )

    out_padded = pl.pallas_call(
        hypernet_kernel,
        out_shape=jax.ShapeDtypeStruct((B_pad, out_f), x.dtype),
        grid_spec=pltpu.PrefetchScalarGridSpec(
            num_scalar_prefetch=0,
            grid=grid,
            in_specs=[
                # activations: tiled over batch; in_f is the full (unpadded)
                # array dim -> allowed by the full-dim exception.
                pl.BlockSpec((tile_b, in_f), lambda i: (i, 0)),
                # weights / biases: full arrays, constant index_map -> VMEM
                # resident across all grid steps.
                pl.BlockSpec((in_f, hid_pad), lambda i: (0, 0)),
                pl.BlockSpec((1, hid_pad), lambda i: (0, 0)),
                pl.BlockSpec((hid_pad, hid_pad), lambda i: (0, 0)),
                pl.BlockSpec((1, hid_pad), lambda i: (0, 0)),
                pl.BlockSpec((hid_pad, out_f), lambda i: (0, 0)),
                pl.BlockSpec((1, out_f), lambda i: (0, 0)),
            ],
            # unpadded output columns: no padded-store + wrapper-slice round trip
            out_specs=pl.BlockSpec((tile_b, out_f), lambda i: (i, 0)),
        ),
        compiler_params=pltpu.CompilerParams(
            dimension_semantics=("parallel",),
        ),
        cost_estimate=pl.CostEstimate(
            flops=flops, transcendentals=0, bytes_accessed=bytes_accessed
        ),
    )(x, w1, b1, w2, b2, w3, b3)

    # Only the batch padding (if any) needs slicing; columns are already exact.
    if B_pad != B:
        return out_padded[:B]
    return out_padded


def init_params(key, in_features, hidden_features, out_features, *, use_bf16=False):
    """nn.Linear-style init (uniform(-1/sqrt(fan_in), +1/sqrt(fan_in))) on the
    logical dims.  Weights stored as (in, out) = transpose of PyTorch's
    (out, in).  Only the hidden dims are zero-padded to lane multiples (128);
    input/output feature dims stay unpadded (full-dim blocks in the kernel).
    Optional bf16 storage for v6e/v7x MXU throughput (not bit-exact vs f32)."""
    hid_pad = _round_up(hidden_features, _LANE)
    dtype = jnp.bfloat16 if use_bf16 else jnp.float32

    ks = jax.random.split(key, 6)

    def linear(kw, kb, fan_in, fan_out, fan_in_pad, fan_out_pad):
        bound = 1.0 / jnp.sqrt(jnp.float32(fan_in))
        w = jax.random.uniform(kw, (fan_in, fan_out), jnp.float32, -bound, bound)
        b = jax.random.uniform(kb, (1, fan_out), jnp.float32, -bound, bound)
        w = jnp.pad(w, ((0, fan_in_pad - fan_in), (0, fan_out_pad - fan_out)))
        b = jnp.pad(b, ((0, 0), (0, fan_out_pad - fan_out)))
        return w.astype(dtype), b.astype(jnp.float32)

    w1, b1 = linear(ks[0], ks[1], in_features, hidden_features, in_features, hid_pad)
    w2, b2 = linear(ks[2], ks[3], hidden_features, hidden_features, hid_pad, hid_pad)
    w3, b3 = linear(ks[4], ks[5], hidden_features, out_features, hid_pad, out_features)
    return {
        "w1": w1, "b1": b1,
        "w2": w2, "b2": b2,
        "w3": w3, "b3": b3,
        "in_features": in_features,
        "hidden_features": hidden_features,
        "out_features": out_features,
    }


def reference_forward(x, p):
    """Pure-JAX reference on the unpadded logical weights (f32)."""
    in_f, hid, out_f = p["in_features"], p["hidden_features"], p["out_features"]
    w1 = p["w1"][:in_f, :hid].astype(jnp.float32)
    w2 = p["w2"][:hid, :hid].astype(jnp.float32)
    w3 = p["w3"][:hid, :out_f].astype(jnp.float32)
    b1, b2, b3 = p["b1"][:, :hid], p["b2"][:, :hid], p["b3"][:, :out_f]
    h1 = jnp.maximum(x @ w1 + b1, 0.0)
    h2 = jnp.maximum(h1 @ w2 + b2, 0.0)
    return h2 @ w3 + b3


if __name__ == "__main__":
    # Hypernetwork(in_features=4, hidden_features=32, hidden_layers=3, out_features=16)
    # (hidden_layers is unused by the reference module's forward, and here too.)
    in_features, hidden_features, out_features = 4, 32, 16
    batch = 16

    key = jax.random.PRNGKey(0)
    k_x, k_p = jax.random.split(key)

    x = jax.random.normal(k_x, (batch, in_features), dtype=jnp.float32)
    params = init_params(k_p, in_features, hidden_features, out_features)

    out = hypernetwork_forward(x, params)
    out = jax.block_until_ready(out)

    ref = reference_forward(x, params)
    assert out.shape == (batch, out_features), f"bad shape {out.shape}"
    assert jnp.allclose(out, ref, atol=1e-5, rtol=1e-5), "mismatch vs pure-JAX reference"

    print("KERNEL_OK")
</pallas_src>

<mosaic_0001>
module attributes {stable_mosaic.version = 11 : i64} {
  func.func @hypernet_kernel(%arg0: i32, %arg1: memref<16x4xf32, #tpu.memory_space<vmem>>, %arg2: memref<4x128xf32, #tpu.memory_space<vmem>>, %arg3: memref<1x128xf32, #tpu.memory_space<vmem>>, %arg4: memref<128x128xf32, #tpu.memory_space<vmem>>, %arg5: memref<1x128xf32, #tpu.memory_space<vmem>>, %arg6: memref<128x16xf32, #tpu.memory_space<vmem>>, %arg7: memref<1x16xf32, #tpu.memory_space<vmem>>, %arg8: memref<16x16xf32, #tpu.memory_space<vmem>>) attributes {dimension_semantics = [#tpu.dimension_semantics<parallel>], iteration_bounds = array<i64: 1>, scalar_prefetch = 0 : i64, scratch_operands = 0 : i64, tpu.core_type = #tpu.core_type<tc>, window_params = [{transform_indices = @transform_0, window_bounds = array<i64: 16, 4>}, {pipeline_mode = #tpu.pipeline_mode<synchronous>, transform_indices = @transform_1, window_bounds = array<i64: 4, 128>}, {pipeline_mode = #tpu.pipeline_mode<synchronous>, transform_indices = @transform_2, window_bounds = array<i64: 1, 128>}, {pipeline_mode = #tpu.pipeline_mode<synchronous>, transform_indices = @transform_3, window_bounds = array<i64: 128, 128>}, {pipeline_mode = #tpu.pipeline_mode<synchronous>, transform_indices = @transform_4, window_bounds = array<i64: 1, 128>}, {pipeline_mode = #tpu.pipeline_mode<synchronous>, transform_indices = @transform_5, window_bounds = array<i64: 128, 16>}, {pipeline_mode = #tpu.pipeline_mode<synchronous>, transform_indices = @transform_6, window_bounds = array<i64: 1, 16>}, {transform_indices = @transform_7, window_bounds = array<i64: 16, 16>}]} {
    %c0 = arith.constant 0 : index
    %c0_0 = arith.constant 0 : index
    %0 = vector.load %arg1[%c0, %c0_0] : memref<16x4xf32, #tpu.memory_space<vmem>>, vector<16x4xf32>
    %c0_1 = arith.constant 0 : index
    %c0_2 = arith.constant 0 : index
    %1 = vector.load %arg2[%c0_1, %c0_2] : memref<4x128xf32, #tpu.memory_space<vmem>>, vector<4x128xf32>
    %cst = arith.constant dense<0.000000e+00> : vector<16x128xf32>
    %2 = tpu.matmul %0, %1, %cst {dimension_numbers = #tpu.dot_dimension_numbers<[1], [0], [0], [1], [0, 0, 1, 1], [], []>} : vector<16x4xf32>, vector<4x128xf32>, vector<16x128xf32> -> vector<16x128xf32>
    %c0_3 = arith.constant 0 : index
    %c0_4 = arith.constant 0 : index
    %3 = vector.load %arg3[%c0_3, %c0_4] : memref<1x128xf32, #tpu.memory_space<vmem>>, vector<1x128xf32>
    %4 = vector.broadcast %3 : vector<1x128xf32> to vector<16x128xf32>
    %5 = arith.addf %2, %4 : vector<16x128xf32>
    %cst_5 = arith.constant 0.000000e+00 : f32
    %6 = vector.broadcast %cst_5 : f32 to vector<16x128xf32>
    %7 = arith.maximumf %5, %6 : vector<16x128xf32>
    %c0_6 = arith.constant 0 : index
    %c0_7 = arith.constant 0 : index
    %8 = vector.load %arg4[%c0_6, %c0_7] : memref<128x128xf32, #tpu.memory_space<vmem>>, vector<128x128xf32>
    %cst_8 = arith.constant dense<0.000000e+00> : vector<16x128xf32>
    %9 = tpu.matmul %7, %8, %cst_8 {dimension_numbers = #tpu.dot_dimension_numbers<[1], [0], [0], [1], [0, 0, 1, 1], [], []>} : vector<16x128xf32>, vector<128x128xf32>, vector<16x128xf32> -> vector<16x128xf32>
    %c0_9 = arith.constant 0 : index
    %c0_10 = arith.constant 0 : index
    %10 = vector.load %arg5[%c0_9, %c0_10] : memref<1x128xf32, #tpu.memory_space<vmem>>, vector<1x128xf32>
    %11 = vector.broadcast %10 : vector<1x128xf32> to vector<16x128xf32>
    %12 = arith.addf %9, %11 : vector<16x128xf32>
    %cst_11 = arith.constant 0.000000e+00 : f32
    %13 = vector.broadcast %cst_11 : f32 to vector<16x128xf32>
    %14 = arith.maximumf %12, %13 : vector<16x128xf32>
    %c0_12 = arith.constant 0 : index
    %c0_13 = arith.constant 0 : index
    %15 = vector.load %arg6[%c0_12, %c0_13] : memref<128x16xf32, #tpu.memory_space<vmem>>, vector<128x16xf32>
    %cst_14 = arith.constant dense<0.000000e+00> : vector<16x16xf32>
    %16 = tpu.matmul %14, %15, %cst_14 {dimension_numbers = #tpu.dot_dimension_numbers<[1], [0], [0], [1], [0, 0, 1, 1], [], []>} : vector<16x128xf32>, vector<128x16xf32>, vector<16x16xf32> -> vector<16x16xf32>
    %c0_15 = arith.constant 0 : index
    %c0_16 = arith.constant 0 : index
    %17 = vector.load %arg7[%c0_15, %c0_16] : memref<1x16xf32, #tpu.memory_space<vmem>>, vector<1x16xf32>
    %18 = vector.broadcast %17 : vector<1x16xf32> to vector<16x16xf32>
    %19 = arith.addf %16, %18 : vector<16x16xf32>
    %c0_17 = arith.constant 0 : index
    %c0_18 = arith.constant 0 : index
    %20 = vector.load %arg8[%c0_17, %c0_18] : memref<16x16xf32, #tpu.memory_space<vmem>>, vector<16x16xf32>
    tpu.vector_store %arg8[%c0_17, %c0_18], %19 {strides = array<i32>} : memref<16x16xf32, #tpu.memory_space<vmem>>, vector<16x16xf32>,
    return
  }
  func.func @transform_0(%arg0: i32) -> (i32, i32) {
    %c0_i32 = arith.constant 0 : i32
    %c0_i32_0 = arith.constant 0 : i32
    return %arg0, %c0_i32 : i32, i32
  }
  func.func @transform_1(%arg0: i32) -> (i32, i32) {
    %c0_i32 = arith.constant 0 : i32
    %c0_i32_0 = arith.constant 0 : i32
    %c0_i32_1 = arith.constant 0 : i32
    return %c0_i32, %c0_i32_0 : i32, i32
  }
  func.func @transform_2(%arg0: i32) -> (i32, i32) {
    %c0_i32 = arith.constant 0 : i32
    %c0_i32_0 = arith.constant 0 : i32
    %c0_i32_1 = arith.constant 0 : i32
    return %c0_i32, %c0_i32_0 : i32, i32
  }
  func.func @transform_3(%arg0: i32) -> (i32, i32) {
    %c0_i32 = arith.constant 0 : i32
    %c0_i32_0 = arith.constant 0 : i32
    %c0_i32_1 = arith.constant 0 : i32
    return %c0_i32, %c0_i32_0 : i32, i32
  }
  func.func @transform_4(%arg0: i32) -> (i32, i32) {
    %c0_i32 = arith.constant 0 : i32
    %c0_i32_0 = arith.constant 0 : i32
    %c0_i32_1 = arith.constant 0 : i32
    return %c0_i32, %c0_i32_0 : i32, i32
  }
  func.func @transform_5(%arg0: i32) -> (i32, i32) {
    %c0_i32 = arith.constant 0 : i32
    %c0_i32_0 = arith.constant 0 : i32
    %c0_i32_1 = arith.constant 0 : i32
    return %c0_i32, %c0_i32_0 : i32, i32
  }
  func.func @transform_6(%arg0: i32) -> (i32, i32) {
    %c0_i32 = arith.constant 0 : i32
    %c0_i32_0 = arith.constant 0 : i32
    %c0_i32_1 = arith.constant 0 : i32
    return %c0_i32, %c0_i32_0 : i32, i32
  }
  func.func @transform_7(%arg0: i32) -> (i32, i32) {
    %c0_i32 = arith.constant 0 : i32
    %c0_i32_0 = arith.constant 0 : i32
    return %arg0, %c0_i32 : i32, i32
  }
}

</mosaic_0001>

<bundles_post_ra>
// kernel: tpu_custom_call.1
= control target key start
LH: loop header
LB: loop body
LE: loop exit
PB: predicated region body
PF: predicated region fallthrough
CT: control target
= control target key end

     0   :  { %vm44_vm0 = vcmask 1043456   ;;  %vm37_vm1 = vcmask 31744   ;;  %s647_s0 = inlined_call_operand.vmem [shape: f32[16,4], index: 0, kind: input, shape index: {}]   ;;  %s648_s1 = inlined_call_operand.vmem [shape: f32[4,128], index: 1, kind: input, shape index: {}]   ;;  %s649_s2 = inlined_call_operand.vmem [shape: f32[1,128], index: 2, kind: input, shape index: {}]   ;;  %s650_s3 = inlined_call_operand.vmem [shape: f32[128,128], index: 3, kind: input, shape index: {}]   ;;  %s651_s4 = inlined_call_operand.vmem [shape: f32[1,128], index: 4, kind: input, shape index: {}]   ;;  %s652_s5 = inlined_call_operand.vmem [shape: f32[128,16], index: 5, kind: input, shape index: {}]   ;;  %s653_s6 = inlined_call_operand.vmem [shape: f32[1,16], index: 6, kind: input, shape index: {}]   ;;  %s654_s7 = inlined_call_operand.hbm [shape: f32[16,16], index: 7, kind: output, shape index: {}]  }
   0x1   :  { %v29_v0 = vld [vmem:[%s648_s1] sm:$0xf]  ;;  %v28_v2 = vld [vmem:[%s647_s0 + $0x8] sm:$0xff]  ;;  %v140_v3 = vld [vmem:[%s650_s3 + $0x78] sm:$0xff] }
   0x2   :  { %v27_v1 = vld [vmem:[%s647_s0] sm:$0xff]  ;;  %387 = vmatprep.subr.msk.mxu0 %vm44_vm0, %v29_v0  ;;  %v139_v4 = vld [vmem:[%s650_s3 + $0x70] sm:$0xff]  ;;  %392 = vmatprep.subr.mxu1 %v140_v3  ;;  %v138_v5 = vld [vmem:[%s650_s3 + $0x68] sm:$0xff] }
   0x3   :  { %389 = vmatprep.mubr.msk.f32.mxu0 %vm37_vm1, %v27_v1  ;;  %388 = vmatpush3.msk.msra.mxu0 %vm44_vm0, %v29_v0  ;;  %v137_v6 = vld [vmem:[%s650_s3 + $0x60] sm:$0xff] }
   0x4   :  { %390 = vmatmul.mubr.msk.f32.vlgmr.msra.gmra.mxu0 %vm37_vm1, %v28_v2  ;;  %393 = vmatpush3.msra.mxu1 %v140_v3 }
   0x5   :  { %394 = vmatprep.subr.mxu1 %v139_v4 }
   0x6   :  { %395 = vmatpush3.msra.mxu1 %v139_v4 }
   0x7   :  { %12 = vsyncpa [#allocation3], 0  ;;  %396 = vmatprep.subr.mxu1 %v138_v5  ;;  %v136_v7 = vld [vmem:[%s650_s3 + $0x58] sm:$0xff]  ;;  %v135_v8 = vld [vmem:[%s650_s3 + $0x50] sm:$0xff]  ;;  %s487_s22 = smov [#allocation2]   ;;  %vm323_vm2 = vcmask 130048  }
   0x8   :  { %397 = vmatpush3.msra.mxu1 %v138_v5  ;;  %v134_v9 = vld [vmem:[%s650_s3 + $0x48] sm:$0xff]  ;;  %v133_v10 = vld [vmem:[%s650_s3 + $0x40] sm:$0xff]  ;;  %v132_v11 = vld [vmem:[%s650_s3 + $0x38] sm:$0xff] }
   0x9   :  { %398 = vmatprep.subr.mxu1 %v137_v6  ;;  %v131_v12 = vld [vmem:[%s650_s3 + $0x30] sm:$0xff]  ;;  %v130_v13 = vld [vmem:[%s650_s3 + $0x28] sm:$0xff]  ;;  %v129_v14 = vld [vmem:[%s650_s3 + $0x20] sm:$0xff] }
   0xa   :  { %399 = vmatpush3.msra.mxu1 %v137_v6  ;;  %v128_v15 = vld [vmem:[%s650_s3 + $0x18] sm:$0xff]  ;;  %v127_v16 = vld [vmem:[%s650_s3 + $0x10] sm:$0xff]  ;;  %v126_v17 = vld [vmem:[%s650_s3 + $0x8] sm:$0xff] }
   0xb   :  { %400 = vmatprep.subr.mxu1 %v136_v7  ;;  %v125_v18 = vld [vmem:[%s650_s3] sm:$0xff]  ;;  %v240_v19 = vld [vmem:[%s652_s5 + $0x78] sm:$0xff]  ;;  %v239_v20 = vld [vmem:[%s652_s5 + $0x70] sm:$0xff] }
   0xc   :  { %401 = vmatpush3.msra.mxu1 %v136_v7  ;;  %427 = vmatprep.subr.mxu0 %v240_v19  ;;  %v238_v21 = vld [vmem:[%s652_s5 + $0x68] sm:$0xff]  ;;  %v237_v22 = vld [vmem:[%s652_s5 + $0x60] sm:$0xff]  ;;  %v236_v23 = vld [vmem:[%s652_s5 + $0x58] sm:$0xff] }
   0xd   :  { %402 = vmatprep.subr.mxu1 %v135_v8  ;;  %428 = vmatpush3.msra.mxu0 %v240_v19  ;;  %v235_v24 = vld [vmem:[%s652_s5 + $0x50] sm:$0xff]  ;;  %v234_v25 = vld [vmem:[%s652_s5 + $0x48] sm:$0xff]  ;;  %v233_v26 = vld [vmem:[%s652_s5 + $0x40] sm:$0xff] }
   0xe   :  { %403 = vmatpush3.msra.mxu1 %v135_v8  ;;  %429 = vmatprep.subr.mxu0 %v239_v20  ;;  %v232_v27 = vld [vmem:[%s652_s5 + $0x38] sm:$0xff]  ;;  %v231_v28 = vld [vmem:[%s652_s5 + $0x30] sm:$0xff]  ;;  %v230_v29 = vld [vmem:[%s652_s5 + $0x28] sm:$0xff] }
   0xf   :  { %404 = vmatprep.subr.mxu1 %v134_v9  ;;  %430 = vmatpush3.msra.mxu0 %v239_v20  ;;  %v229_v30 = vld [vmem:[%s652_s5 + $0x20] sm:$0xff]  ;;  %v228_v38 = vld [vmem:[%s652_s5 + $0x18] sm:$0xff]  ;;  %v227_v39 = vld [vmem:[%s652_s5 + $0x10] sm:$0xff] }
  0x10   :  { %405 = vmatpush3.msra.mxu1 %v134_v9  ;;  %431 = vmatprep.subr.mxu0 %v238_v21  ;;  %v342_v31 = vld [vmem:[%s649_s2] ss:$0 sm:$0xff]  ;;  %v226_v40 = vld [vmem:[%s652_s5 + $0x8] sm:$0xff] }
  0x11   :  { %406 = vmatprep.subr.mxu1 %v133_v10  ;;  %432 = vmatpush3.msra.mxu0 %v238_v21  ;;  %v225_v41 = vld [vmem:[%s652_s5] sm:$0xff]  ;;  %s331_s5 = sshll.u32 %s487_s22, 4  ;;  %s332_s5 = int_to_ptr.vmem [resolvable:$true] %s331_s5 }
  0x12   :  { %407 = vmatpush3.msra.mxu1 %v133_v10  ;;  %433 = vmatprep.subr.mxu0 %v237_v22  ;;  %v346_v42 = vld [vmem:[%s651_s4] ss:$0 sm:$0xff]  ;;  %s465_s4 = scalar_lea.vmem %s332_s5, 256  ;;  %p470_p1 = scmp.lt.s32.totalorder %s332_s5, %s332_s5 }
  0x13   :  { %408 = vmatprep.subr.mxu1 %v132_v11  ;;  %434 = vmatpush3.msra.mxu0 %v237_v22  ;;  %v347_v49 = vld [vmem:[%s653_s6] ss:$0 sm:$0xff]  ;;  %p466_p0 = scmp.ne.s32.totalorder %s332_s5, %s465_s4  ;;  %p471_p2 = scmp.lt.s32.totalorder %s465_s4, %s465_s4 }
  0x14   :  { %409 = vmatpush3.msra.mxu1 %v132_v11  ;;  %435 = vmatprep.subr.mxu0 %v236_v23 }
  0x15   :  { %410 = vmatprep.subr.mxu1 %v131_v12  ;;  %436 = vmatpush3.msra.mxu0 %v236_v23  ;;  %p472_p3 = por %p471_p2, %p470_p1 }
  0x16   :  { %411 = vmatpush3.msra.mxu1 %v131_v12  ;;  %437 = vmatprep.subr.mxu0 %v235_v24 }
  0x17   :  { %412 = vmatprep.subr.mxu1 %v130_v13  ;;  %438 = vmatpush3.msra.mxu0 %v235_v24  ;;  %p473_p4 = pnand %p472_p3, %p466_p0 }
  0x18   :  { %413 = vmatpush3.msra.mxu1 %v130_v13  ;;  %439 = vmatprep.subr.mxu0 %v234_v25 }
  0x19   :  { %414 = vmatprep.subr.mxu1 %v129_v14  ;;  %440 = vmatpush3.msra.mxu0 %v234_v25 }
  0x1a   :  { %415 = vmatpush3.msra.mxu1 %v129_v14  ;;  %441 = vmatprep.subr.mxu0 %v233_v26 }
  0x1b   :  { %416 = vmatprep.subr.mxu1 %v128_v15  ;;  %442 = vmatpush3.msra.mxu0 %v233_v26 }
  0x1c   :  { %417 = vmatpush3.msra.mxu1 %v128_v15  ;;  %443 = vmatprep.subr.mxu0 %v232_v27 }
  0x1d   :  { %418 = vmatprep.subr.mxu1 %v127_v16  ;;  %444 = vmatpush3.msra.mxu0 %v232_v27 }
  0x1e   :  { %419 = vmatpush3.msra.mxu1 %v127_v16  ;;  %445 = vmatprep.subr.mxu0 %v231_v28 }
  0x1f   :  { %420 = vmatprep.subr.mxu1 %v126_v17  ;;  %446 = vmatpush3.msra.mxu0 %v231_v28 }
  0x20   :  { %421 = vmatpush3.msra.mxu1 %v126_v17  ;;  %447 = vmatprep.subr.mxu0 %v230_v29 }
  0x21   :  { %422 = vmatprep.subr.mxu1 %v125_v18  ;;  %448 = vmatpush3.msra.mxu0 %v230_v29 }
  0x22   :  { %423 = vmatpush3.msra.mxu1 %v125_v18  ;;  %449 = vmatprep.subr.mxu0 %v229_v30 }
  0x23   :  { %450 = vmatpush3.msra.mxu0 %v229_v30 }
  0x24   :  { %451 = vmatprep.subr.mxu0 %v228_v38 }
  0x25   :  { %452 = vmatpush3.msra.mxu0 %v228_v38 }
  0x26   :  { %453 = vmatprep.subr.mxu0 %v227_v39 }
  0x27   :  { %454 = vmatpush3.msra.mxu0 %v227_v39 }
  0x28   :  { %455 = vmatprep.subr.mxu0 %v226_v40 }
  0x29   :  { %456 = vmatpush3.msra.mxu0 %v226_v40 }
  0x2a   :  { %457 = vmatprep.subr.mxu0 %v225_v41 }
  0x2b   :  { %458 = vmatpush3.msra.mxu0 %v225_v41 }
  0xc4   :  { %v391_v32 = vpop.f32.mrf.mxu0 }
  0xc5   :  { %v120_v33 = vadd.f32 %v391_v32, %v342_v31 }
  0xc6   :  { %v114_v34 = vpop.f32.mrf.mxu0 }
  0xc7   :  { %v115_v35 = vadd.f32 %v342_v31, %v114_v34  ;;  %v124_v37 = vmax.f32 %v120_v33, 0.0 }
  0xc9   :  { %v123_v36 = vmax.f32 %v115_v35, 0.0 }
  0xcb   :  { %424 = vmatprep.mubr.f32.mxu1 %v123_v36 }
  0xcc   :  { %425 = vmatmul.mubr.f32.vlgmr.msra.gmra.mxu1 %v124_v37 }
 0x18c   :  { %v426_v43 = vpop.f32.mrf.mxu1 }
 0x18d   :  { %v220_v44 = vadd.f32 %v426_v43, %v346_v42 }
 0x18e   :  { %v214_v45 = vpop.f32.mrf.mxu1 }
 0x18f   :  { %v215_v46 = vadd.f32 %v346_v42, %v214_v45  ;;  %v224_v48 = vmax.f32 %v220_v44, 0.0 }
 0x191   :  { %v223_v47 = vmax.f32 %v215_v46, 0.0 }
 0x193   :  { %459 = vmatprep.mubr.f32.mxu0 %v223_v47 }
 0x194   :  { %460 = vmatmul.mubr.f32.vlgmr.msra.gmra.mxu0 %v224_v48 }
 0x254   :  { %v461_v50 = vpop.f32.mrf.mxu0 }
 0x255   :  { %v320_v51 = vadd.f32 %v461_v50, %v347_v49 }
 0x256   :  { %v314_v52 = vpop.f32.mrf.mxu0 }
 0x257   :  { %325 = vst.msk [vmem:[#allocation2 + $0x8] sm:$0xff] %vm323_vm2, %v320_v51  ;;  %v315_v53 = vadd.f32 %v347_v49, %v314_v52 }
 0x259   :  { %324 = vst.msk [vmem:[#allocation2] sm:$0xff] %vm323_vm2, %v315_v53 }
 0x25a   :  { %476 = shalt.err (!%p473_p4)
}
 0x25b   :  { %s488_s23 = smov 128   ;;  %s489_s24 = smov 8  }
 0x25c   :  { %337 = dma.vmem_to_hbm [thread:$0]  %s332_s5, 256, %s654_s7, [#allocation3], %s488_s23, %s488_s23, %s489_s24  }
 0x25d   :  { %485 = dma.done.wait [#allocation3], 256  }
 0x25e   :  { %486 = vsyncadd [#allocation3], 4294967040 }
 0x25f   :  { %341 = vsyncpa [#allocation3], 1 }

</bundles_post_ra>
